<compile_context>
chip_gen: v7x
topology: tpu7x:2x2x1
jax: 0.10.0
libtpu: 0.0.40
codegen_flags: <defaults>
</compile_context>

<pallas_src>
import jax
import jax.numpy as jnp
from jax.experimental import pallas as pl
from jax.experimental.pallas import tpu as pltpu


def _round_up(v, m):
    return ((v + m - 1) // m) * m


# ---------------------------------------------------------------------------
# Single-pass kernel: one block = (Nb samples, all C, all H*W).
# ---------------------------------------------------------------------------
def _make_se_kernel(inv_hw):
    def kernel(x_ref, w1_ref, b1_ref, w2_ref, b2_ref, o_ref):
        # x_ref : (Nb, C, HW)      w1_ref: (1, C, hidden)   b1_ref: (1, 1, hidden)
        # w2_ref: (1, C, hidden)   b2_ref: (1, C, 1)        o_ref : (Nb, C, HW)
        x = x_ref[...].astype(jnp.float32)
        # AdaptiveAvgPool2d(1): reduce the lane (spatial) dim; divide by true HW.
        pooled = jnp.sum(x, axis=-1, keepdims=True) * inv_hw          # (Nb, C, 1)
        # fc1 (1x1 conv) + ReLU: broadcast over lanes (hidden), reduce sublanes (C).
        # C*hidden is tiny vs C*HW, so this VPU/XLU work is negligible and the
        # kernel stays free of relayout-heavy reshapes.
        h = jnp.sum(pooled * w1_ref[...], axis=1, keepdims=True)      # (Nb, 1, hidden)
        h = jnp.maximum(h + b1_ref[...], 0.0)
        # fc2 (1x1 conv) + Sigmoid: broadcast over sublanes (C), reduce lanes.
        s = jnp.sum(h * w2_ref[...], axis=2, keepdims=True) + b2_ref[...]  # (Nb, C, 1)
        s = jax.nn.sigmoid(s)
        # Channel-wise rescale of the identity (broadcast over lanes).
        o_ref[...] = (x * s).astype(o_ref.dtype)
    return kernel


def _se_single_pass(xf, w1, b1, w2, b2, inv_hw, target_block_bytes,
                    fc_scratch_bytes, Cp, HWp, Hp):
    N, C, HW = xf.shape
    hidden = w1.shape[0]
    itemsize = jnp.dtype(xf.dtype).itemsize
    sample_vmem = Cp * HWp * itemsize          # padded VMEM bytes of one sample

    # Samples per block: hit the block-size target, keep the FC broadcast
    # intermediate (Nb, C, hidden) bounded, and keep >= 2 grid steps when
    # N > 1 so both v7x TensorCores get work.
    spb = max(1, int(target_block_bytes) // sample_vmem)
    fc_cap = max(1, int(fc_scratch_bytes) // (Cp * Hp * 4))
    spb = min(spb, fc_cap, N)
    if N > 1 and spb >= N:
        spb = -(-N // 2)
    Nb = int(spb)
    num_blocks = -(-N // Nb)

    f32 = jnp.float32
    # w1e[0, c, j] = w1[j, c];  w2e[0, c, j] = w2[c, j]   (tiny wrapper-side ops)
    w1e = jnp.transpose(w1).astype(f32).reshape(1, C, hidden)
    b1e = b1.astype(f32).reshape(1, 1, hidden)
    w2e = w2.astype(f32).reshape(1, C, hidden)
    b2e = b2.astype(f32).reshape(1, C, 1)

    # Explicit VMEM budget: double-buffered x + out, f32 upcast copy (if any),
    # FC broadcast temporaries, double-buffered params, plus headroom.
    blk = Nb * Cp * HWp * itemsize
    upcast = 0 if xf.dtype == jnp.float32 else Nb * Cp * HWp * 4
    fc_tmp = 2 * Nb * Cp * Hp * 4
    params = 2 * 4 * (2 * Cp * Hp + Cp * 128 + 8 * Hp)
    vmem_limit = int(min(max(4 * blk + upcast + fc_tmp + params + (2 << 20),
                             8 << 20), 40 << 20))

    cost = pl.CostEstimate(
        flops=2 * N * C * HW + 4 * N * C * hidden,
        transcendentals=N * C,
        bytes_accessed=2 * N * C * HW * itemsize,
    )

    return pl.pallas_call(
        _make_se_kernel(inv_hw),
        out_shape=jax.ShapeDtypeStruct((N, C, HW), xf.dtype),
        grid_spec=pltpu.PrefetchScalarGridSpec(
            num_scalar_prefetch=0,
            grid=(num_blocks,),
            in_specs=[
                pl.BlockSpec((Nb, C, HW), lambda i: (i, 0, 0)),     # x (whole samples)
                pl.BlockSpec((1, C, hidden), lambda i: (0, 0, 0)),  # fc1 weight (T)
                pl.BlockSpec((1, 1, hidden), lambda i: (0, 0, 0)),  # fc1 bias
                pl.BlockSpec((1, C, hidden), lambda i: (0, 0, 0)),  # fc2 weight
                pl.BlockSpec((1, C, 1), lambda i: (0, 0, 0)),       # fc2 bias
            ],
            out_specs=pl.BlockSpec((Nb, C, HW), lambda i: (i, 0, 0)),
        ),
        compiler_params=pltpu.CompilerParams(
            dimension_semantics=("parallel",),
            vmem_limit_bytes=vmem_limit,
        ),
        cost_estimate=cost,
    )(xf, w1e, b1e, w2e, b2e)


# ---------------------------------------------------------------------------
# Two-pass HW-tiled fallback for samples too large to hold in VMEM.
# ---------------------------------------------------------------------------
def _make_pool_kernel(hw_chunk, true_hw, needs_mask):
    def kernel(x_ref, sum_ref):
        @pl.when(pl.program_id(1) == 0)
        def _init():
            sum_ref[...] = jnp.zeros_like(sum_ref)
        x = x_ref[...].astype(jnp.float32)                 # (1, C, hw_chunk)
        if needs_mask:
            # Edge HW chunk: zero out lanes beyond the true spatial extent.
            col = jax.lax.broadcasted_iota(jnp.int32, x.shape, 2)
            col = col + pl.program_id(1) * hw_chunk
            x = jnp.where(col < true_hw, x, 0.0)
        sum_ref[...] += jnp.sum(x, axis=-1, keepdims=True)
    return kernel


def _scale_kernel(x_ref, s_ref, o_ref):
    o_ref[...] = (x_ref[...].astype(jnp.float32) * s_ref[...]).astype(o_ref.dtype)


def _se_two_pass(xf, w1, b1, w2, b2, inv_hw, target_block_bytes, Cp, HWp):
    N, C, HW = xf.shape
    itemsize = jnp.dtype(xf.dtype).itemsize
    f32 = jnp.float32

    hw_chunk = max(128, (int(target_block_bytes) // (Cp * itemsize)) // 128 * 128)
    hw_chunk = min(hw_chunk, HWp)
    num_hw = -(-HW // hw_chunk)
    needs_mask = (HW % hw_chunk) != 0

    blk = Cp * hw_chunk * itemsize
    upcast = Cp * hw_chunk * 4
    small = Cp * 128 * 4
    vmem1 = int(min(max(2 * blk + upcast + 2 * small + (2 << 20), 8 << 20), 40 << 20))
    vmem2 = int(min(max(4 * blk + upcast + 2 * small + (2 << 20), 8 << 20), 40 << 20))

    # Pass 1: per-(sample, channel) spatial sums, accumulated over HW chunks.
    sums = pl.pallas_call(
        _make_pool_kernel(hw_chunk, HW, needs_mask),
        out_shape=jax.ShapeDtypeStruct((N, C, 1), f32),
        grid_spec=pltpu.PrefetchScalarGridSpec(
            num_scalar_prefetch=0,
            grid=(N, num_hw),
            in_specs=[pl.BlockSpec((1, C, hw_chunk), lambda n, h: (n, 0, h))],
            out_specs=pl.BlockSpec((1, C, 1), lambda n, h: (n, 0, 0)),
        ),
        compiler_params=pltpu.CompilerParams(
            dimension_semantics=("parallel", "arbitrary"),
            vmem_limit_bytes=vmem1,
        ),
    )(xf)

    # Tiny per-sample FC in plain JAX (O(N*C*hidden) flops, negligible).
    pooled = sums[:, :, 0].astype(f32) * inv_hw                        # (N, C)
    h = jnp.maximum(pooled @ w1.astype(f32).T + b1.astype(f32)[None, :], 0.0)
    s = jax.nn.sigmoid(h @ w2.astype(f32).T + b2.astype(f32)[None, :])
    s = s.astype(f32)[:, :, None]                                      # (N, C, 1)

    # Pass 2: channel-wise rescale of the identity.
    return pl.pallas_call(
        _scale_kernel,
        out_shape=jax.ShapeDtypeStruct((N, C, HW), xf.dtype),
        grid_spec=pltpu.PrefetchScalarGridSpec(
            num_scalar_prefetch=0,
            grid=(N, num_hw),
            in_specs=[pl.BlockSpec((1, C, hw_chunk), lambda n, h: (n, 0, h)),
                      pl.BlockSpec((1, C, 1), lambda n, h: (n, 0, 0))],
            out_specs=pl.BlockSpec((1, C, hw_chunk), lambda n, h: (n, 0, h)),
        ),
        compiler_params=pltpu.CompilerParams(
            dimension_semantics=("parallel", "parallel"),
            vmem_limit_bytes=vmem2,
        ),
    )(xf, s)


# ---------------------------------------------------------------------------
# Public wrapper.
# ---------------------------------------------------------------------------
def se_module(x, w1, b1, w2, b2, *,
              target_block_bytes=4 << 20,
              max_sample_block_bytes=None,
              fc_scratch_bytes=2 << 20):
    """SEModule forward.  x: (N,C,H,W); w1: (hidden,C); b1: (hidden,);
    w2: (C,hidden); b2: (C,).  Returns sigmoid(fc2(relu(fc1(avgpool(x))))) * x."""
    N, C, H, W = x.shape
    hidden = w1.shape[0]
    assert w1.shape == (hidden, C) and w2.shape == (C, hidden)
    assert b1.shape == (hidden,) and b2.shape == (C,)

    HW = H * W
    inv_hw = 1.0 / float(HW)
    itemsize = jnp.dtype(x.dtype).itemsize
    Cp = _round_up(C, 8)
    HWp = _round_up(HW, 128)
    Hp = _round_up(max(hidden, 1), 128)

    xf = x.reshape(N, C, HW)                    # free view, no HBM copy
    sample_vmem = Cp * HWp * itemsize

    if max_sample_block_bytes is None:
        max_sample_block_bytes = max(int(target_block_bytes), 6 << 20)

    if sample_vmem <= int(max_sample_block_bytes):
        out = _se_single_pass(xf, w1, b1, w2, b2, inv_hw, target_block_bytes,
                              fc_scratch_bytes, Cp, HWp, Hp)
    else:
        out = _se_two_pass(xf, w1, b1, w2, b2, inv_hw, target_block_bytes,
                           Cp, HWp)
    return out.reshape(N, C, H, W)


if __name__ == "__main__":
    key = jax.random.PRNGKey(0)
    kx, k1, k2, k3, k4, kx2 = jax.random.split(key, 6)

    def reference(x, w1, b1, w2, b2):
        pooled = jnp.mean(x, axis=(2, 3))                         # (N, C)
        h = jnp.maximum(pooled @ w1.T + b1[None, :], 0.0)         # (N, hidden)
        s = jax.nn.sigmoid(h @ w2.T + b2[None, :])                # (N, C)
        return x * s[:, :, None, None]

    # ---- main (single-pass) path: small shapes from the module ----
    N, C, H, W = 2, 4, 16, 16
    reduction = 4.0
    hidden = int(round(C * (1.0 / reduction)))                    # = 1

    x = jax.random.normal(kx, (N, C, H, W), jnp.float32)
    w1 = jax.random.normal(k1, (hidden, C), jnp.float32) * 0.5    # fc1.weight
    b1 = jax.random.normal(k2, (hidden,), jnp.float32) * 0.1      # fc1.bias
    w2 = jax.random.normal(k3, (C, hidden), jnp.float32) * 0.5    # fc2.weight
    b2 = jax.random.normal(k4, (C,), jnp.float32) * 0.1           # fc2.bias

    out = se_module(x, w1, b1, w2, b2)
    jax.block_until_ready(out)
    ref = reference(x, w1, b1, w2, b2)
    assert jnp.allclose(out, ref, atol=1e-5, rtol=1e-5), "single-pass mismatch"

    # ---- two-pass (HW-tiled) fallback path, forced with tiny block budgets ----
    N2, C2, H2, W2 = 2, 8, 12, 12
    hidden2 = int(round(C2 / 4.0))                                # = 2
    x2 = jax.random.normal(kx2, (N2, C2, H2, W2), jnp.float32)
    w1b = jax.random.normal(k1, (hidden2, C2), jnp.float32) * 0.5
    b1b = jax.random.normal(k2, (hidden2,), jnp.float32) * 0.1
    w2b = jax.random.normal(k3, (C2, hidden2), jnp.float32) * 0.5
    b2b = jax.random.normal(k4, (C2,), jnp.float32) * 0.1

    out2 = se_module(x2, w1b, b1b, w2b, b2b,
                     target_block_bytes=4096, max_sample_block_bytes=2048)
    jax.block_until_ready(out2)
    ref2 = reference(x2, w1b, b1b, w2b, b2b)
    assert jnp.allclose(out2, ref2, atol=1e-5, rtol=1e-5), "two-pass mismatch"

    print("KERNEL_OK")
</pallas_src>

<mosaic_0001>
module attributes {stable_mosaic.version = 11 : i64} {
  func.func @kernel(%arg0: i32, %arg1: memref<1x4x256xf32, #tpu.memory_space<vmem>>, %arg2: memref<1x4x1xf32, #tpu.memory_space<vmem>>, %arg3: memref<1x1x1xf32, #tpu.memory_space<vmem>>, %arg4: memref<1x4x1xf32, #tpu.memory_space<vmem>>, %arg5: memref<1x4x1xf32, #tpu.memory_space<vmem>>, %arg6: memref<1x4x256xf32, #tpu.memory_space<vmem>>) attributes {dimension_semantics = [#tpu.dimension_semantics<parallel>], iteration_bounds = array<i64: 2>, scalar_prefetch = 0 : i64, scratch_operands = 0 : i64, tpu.core_type = #tpu.core_type<tc>, window_params = [{transform_indices = @transform_0, window_bounds = array<i64: 1, 4, 256>}, {pipeline_mode = #tpu.pipeline_mode<synchronous>, transform_indices = @transform_1, window_bounds = array<i64: 1, 4, 1>}, {pipeline_mode = #tpu.pipeline_mode<synchronous>, transform_indices = @transform_2, window_bounds = array<i64: 1, 1, 1>}, {pipeline_mode = #tpu.pipeline_mode<synchronous>, transform_indices = @transform_3, window_bounds = array<i64: 1, 4, 1>}, {pipeline_mode = #tpu.pipeline_mode<synchronous>, transform_indices = @transform_4, window_bounds = array<i64: 1, 4, 1>}, {transform_indices = @transform_5, window_bounds = array<i64: 1, 4, 256>}]} {
    %c0 = arith.constant 0 : index
    %c0_0 = arith.constant 0 : index
    %c0_1 = arith.constant 0 : index
    %0 = vector.load %arg1[%c0, %c0_0, %c0_1] : memref<1x4x256xf32, #tpu.memory_space<vmem>>, vector<1x4x256xf32>
    %cst = arith.constant dense<0.000000e+00> : vector<1x4xf32>
    %1 = vector.multi_reduction <add>, %0, %cst [2] : vector<1x4x256xf32> to vector<1x4xf32>
    %2 = vector.shape_cast %1 : vector<1x4xf32> to vector<1x4x1xf32>
    %cst_2 = arith.constant 3.906250e-03 : f32
    %3 = vector.broadcast %cst_2 : f32 to vector<1x4x1xf32>
    %4 = arith.mulf %2, %3 : vector<1x4x1xf32>
    %c0_3 = arith.constant 0 : index
    %c0_4 = arith.constant 0 : index
    %c0_5 = arith.constant 0 : index
    %5 = vector.load %arg2[%c0_3, %c0_4, %c0_5] : memref<1x4x1xf32, #tpu.memory_space<vmem>>, vector<1x4x1xf32>
    %6 = arith.mulf %4, %5 : vector<1x4x1xf32>
    %cst_6 = arith.constant dense<0.000000e+00> : vector<1x1xf32>
    %7 = vector.multi_reduction <add>, %6, %cst_6 [1] : vector<1x4x1xf32> to vector<1x1xf32>
    %8 = vector.shape_cast %7 : vector<1x1xf32> to vector<1x1x1xf32>
    %c0_7 = arith.constant 0 : index
    %c0_8 = arith.constant 0 : index
    %c0_9 = arith.constant 0 : index
    %9 = vector.load %arg3[%c0_7, %c0_8, %c0_9] : memref<1x1x1xf32, #tpu.memory_space<vmem>>, vector<1x1x1xf32>
    %10 = arith.addf %8, %9 : vector<1x1x1xf32>
    %cst_10 = arith.constant 0.000000e+00 : f32
    %11 = vector.broadcast %cst_10 : f32 to vector<1x1x1xf32>
    %12 = arith.maximumf %10, %11 : vector<1x1x1xf32>
    %c0_11 = arith.constant 0 : index
    %c0_12 = arith.constant 0 : index
    %c0_13 = arith.constant 0 : index
    %13 = vector.load %arg4[%c0_11, %c0_12, %c0_13] : memref<1x4x1xf32, #tpu.memory_space<vmem>>, vector<1x4x1xf32>
    %14 = vector.broadcast %12 : vector<1x1x1xf32> to vector<1x4x1xf32>
    %15 = arith.mulf %14, %13 : vector<1x4x1xf32>
    %cst_14 = arith.constant dense<0.000000e+00> : vector<1x4xf32>
    %16 = vector.multi_reduction <add>, %15, %cst_14 [2] : vector<1x4x1xf32> to vector<1x4xf32>
    %17 = vector.shape_cast %16 : vector<1x4xf32> to vector<1x4x1xf32>
    %c0_15 = arith.constant 0 : index
    %c0_16 = arith.constant 0 : index
    %c0_17 = arith.constant 0 : index
    %18 = vector.load %arg5[%c0_15, %c0_16, %c0_17] : memref<1x4x1xf32, #tpu.memory_space<vmem>>, vector<1x4x1xf32>
    %19 = arith.addf %17, %18 : vector<1x4x1xf32>
    %20 = arith.negf %19 : vector<1x4x1xf32>
    %21 = math.exp %20 : vector<1x4x1xf32>
    %cst_18 = arith.constant 1.000000e+00 : f32
    %22 = vector.broadcast %cst_18 : f32 to vector<1x4x1xf32>
    %23 = arith.addf %22, %21 : vector<1x4x1xf32>
    %24 = arith.divf %22, %23 : vector<1x4x1xf32>
    %25 = vector.broadcast %24 : vector<1x4x1xf32> to vector<1x4x256xf32>
    %26 = arith.mulf %0, %25 : vector<1x4x256xf32>
    %c0_19 = arith.constant 0 : index
    %c0_20 = arith.constant 0 : index
    %c0_21 = arith.constant 0 : index
    %27 = vector.load %arg6[%c0_19, %c0_20, %c0_21] : memref<1x4x256xf32, #tpu.memory_space<vmem>>, vector<1x4x256xf32>
    tpu.vector_store %arg6[%c0_19, %c0_20, %c0_21], %26 {strides = array<i32>} : memref<1x4x256xf32, #tpu.memory_space<vmem>>, vector<1x4x256xf32>,
    return
  }
  func.func @transform_0(%arg0: i32) -> (i32, i32, i32) {
    %c0_i32 = arith.constant 0 : i32
    %c0_i32_0 = arith.constant 0 : i32
    %c0_i32_1 = arith.constant 0 : i32
    return %arg0, %c0_i32, %c0_i32_0 : i32, i32, i32
  }
  func.func @transform_1(%arg0: i32) -> (i32, i32, i32) {
    %c0_i32 = arith.constant 0 : i32
    %c0_i32_0 = arith.constant 0 : i32
    %c0_i32_1 = arith.constant 0 : i32
    %c0_i32_2 = arith.constant 0 : i32
    return %c0_i32, %c0_i32_0, %c0_i32_1 : i32, i32, i32
  }
  func.func @transform_2(%arg0: i32) -> (i32, i32, i32) {
    %c0_i32 = arith.constant 0 : i32
    %c0_i32_0 = arith.constant 0 : i32
    %c0_i32_1 = arith.constant 0 : i32
    %c0_i32_2 = arith.constant 0 : i32
    return %c0_i32, %c0_i32_0, %c0_i32_1 : i32, i32, i32
  }
  func.func @transform_3(%arg0: i32) -> (i32, i32, i32) {
    %c0_i32 = arith.constant 0 : i32
    %c0_i32_0 = arith.constant 0 : i32
    %c0_i32_1 = arith.constant 0 : i32
    %c0_i32_2 = arith.constant 0 : i32
    return %c0_i32, %c0_i32_0, %c0_i32_1 : i32, i32, i32
  }
  func.func @transform_4(%arg0: i32) -> (i32, i32, i32) {
    %c0_i32 = arith.constant 0 : i32
    %c0_i32_0 = arith.constant 0 : i32
    %c0_i32_1 = arith.constant 0 : i32
    %c0_i32_2 = arith.constant 0 : i32
    return %c0_i32, %c0_i32_0, %c0_i32_1 : i32, i32, i32
  }
  func.func @transform_5(%arg0: i32) -> (i32, i32, i32) {
    %c0_i32 = arith.constant 0 : i32
    %c0_i32_0 = arith.constant 0 : i32
    %c0_i32_1 = arith.constant 0 : i32
    return %arg0, %c0_i32, %c0_i32_0 : i32, i32, i32
  }
}

</mosaic_0001>

<bundles_post_ra>
// kernel: tpu_custom_call.1
= control target key start
LH: loop header
LB: loop body
LE: loop exit
PB: predicated region body
PF: predicated region fallthrough
CT: control target
= control target key end

     0   :  { %s623_s0 = inlined_call_operand.vmem [shape: f32[2,4,256], index: 0, kind: input, shape index: {}]   ;;  %s624_s1 = inlined_call_operand.vmem [shape: f32[1,4,1], index: 1, kind: input, shape index: {}]   ;;  %s625_s2 = inlined_call_operand.<no memory space> [shape: f32[1,1,1], index: 2, kind: input, shape index: {}]   ;;  %s626_s3 = inlined_call_operand.vmem [shape: f32[1,4,1], index: 3, kind: input, shape index: {}]   ;;  %s627_s4 = inlined_call_operand.vmem [shape: f32[1,4,1], index: 4, kind: input, shape index: {}]   ;;  %s628_s5 = inlined_call_operand.hbm [shape: f32[2,4,256], index: 5, kind: output, shape index: {}]  }
   0x1   :  { %v10_v0 = vstv %s625_s2 }
   0x2   :  { %11 = vst [vmem:[#allocation2] sm:$0x1] %v10_v0 }
   0x3   :  { %12 = vsyncpa [#allocation4], 0 }
   0x4   :  { %14 = vsyncpa [#allocation4 + $0x1], 0  ;;  %s514_s20 = smov 0   ;;  %s516_s21 = smov 0  }
   0x5   :  { %s518_s22 = smov 0   ;;  %s520_s23 = smov 0  }
   0x6 LB: > { %s535_s2 = sadd.s32 4294967295, %s476_s23   ;;  %s352_s24 = sadd.s32 4294967294, %s476_s23   ;;  %s476_s23 = sphi %s520_s23, %s634_s23   ;;  %s472_s22 = sphi %s518_s22, %s633_s22   ;;  %s468_s21 = sphi %s516_s21, %s632_s21   ;;  %s464_s20 = sphi %s514_s20, %s631_s20  }
   0x7   : > { %s539_s25 = sadd.s32 1, %s476_s23   ;;  %s137_s26 = sadd.s32 1, %s472_s22 }
   0x8   : > { %s134_s27 = ssub.s32 %s476_s23, %s539_s25  ;;  %p147_p0 = scmp.ne.s32.totalorder %s472_s22, %s468_s21 }
   0x9   : > { %p135_p1 = scmp.eq.s32.totalorder %s134_s27, 0  ;;  %p148_p2 = scmp.eq.s32.totalorder %s535_s2, 1 }
   0xa   : > { %p153_p3 = scmp.ne.s32.totalorder %s468_s21, %s464_s20  ;;  %p154_p4 = scmp.eq.s32.totalorder %s352_s24, 1 }
   0xb   : > { %s550_s28 = scalar_select %p135_p1, %s472_s22, %s137_s26  }
   0xc   : > { %p552_p5 = por %p148_p2, %p147_p0  ;;  %p556_p6 = por %p154_p4, %p153_p3 }
   0xd   : > { %p355_p7 = scmp.ge.s32.totalorder %s476_s23, 1  ;;  %p192_p8 = scmp.lt.s32.totalorder %s476_s23, 3 }
   0xf   : > { %p193_p9 = pnand %p355_p7, %p192_p8 }
  0x10   : > { %p220_p10 = scmp.lt.s32.totalorder (!%p193_p9), %s535_s2, 1  ;;  %vm229_vm0 = vcmask (!%p193_p9), 1043456   ;;  %v478_v6 = vmov (!%p193_p9), 0   ;;  %v236_v7 = vld [vmem:[%s624_s1] sm:$0xf] (!%p193_p9)  ;;  %vm238_vm1 = vcmask (!%p193_p9), 3072   ;;  %v250_v14 = vlaneseq (!%p193_p9) }
  0x11   : > { %196 = sbr.rel (%p193_p9) target bundleno = 375 (0x177), region = 40  ;;  %408 = vset.pattern.permute.xlu0 (!%p193_p9), %v478_v6  ;;  %v246_v19 = vld [vmem:[#allocation2] sm:$0x1] (!%p193_p9)  ;;  %v479_v33 = vmov (!%p193_p9), 839922192   ;;  %s217_s17 = sand.u32 (!%p193_p9), 1, %s468_s21  }
  0x12   : > { %v251_v17 = vshrl.u32 (!%p193_p9), %v250_v14, 7  ;;  %v249_v24 = vld [vmem:[%s626_s3] sm:$0xf] (!%p193_p9)  ;;  %v269_v34 = vunpack.c.l.s4 (!%p193_p9), %v479_v33  ;;  %s356_s18 = sshll.u32 (!%p193_p9), %s217_s17, 3  ;;  %s366_s19 = sshll.u32 (!%p193_p9), %s535_s2, 7 }
  0x13   : > { %v256_v26 = vld [vmem:[%s627_s4] sm:$0xf] (!%p193_p9)  ;;  %s219_s24 = scalar_lea.vmem (!%p193_p9), [#allocation3], %s356_s18  ;;  %s279_s8 = scalar_lea.sflag (!%p193_p9), [#allocation4], %s217_s17 }
  0x14   : > { %v252_v21 = vsub.s32 (!%p193_p9), 0, %v251_v17  ;;  %v270_v35 = vunpack.c.0.s8 (!%p193_p9), %v269_v34  ;;  %s293_s26 = sshll.u32 (!%p193_p9), %s219_s24, 4  ;;  %s583_s26 = int_to_ptr.vmem [resolvable:$true] %s293_s26 }
  0x15   : > { %s414_s9 = scalar_lea.vmem (!%p193_p9), %s583_s26, 128 }
  0x16   : > { %v273_v36 = vsub.s32 (!%p193_p9), %v270_v35, %v251_v17  ;;  %p415_p11 = scmp.ne.s32.totalorder (!%p193_p9), %s583_s26, %s414_s9 }
  0x18   : > { %s221_s6 = scalar_select %p220_p10, %s535_s2, 1 }
  0x19   : > { %p416_p12 = pnand %p415_p11, %p552_p5  ;;  %s480_s2 = smov [#allocation3]  }
  0x1a   : > { %s365_s7 = sshll.u32 %s221_s6, 3 }
  0x1b   : > { %s224_s10 = scalar_lea.vmem %s623_s0, %s365_s7  ;;  %s581_s7 = scalar_lea.hbm %s628_s5, %s366_s19 }
  0x1c   : > { %v225_v1 = vld [vmem:[%s224_s10] sm:$0xff]  ;;  %p417_p13 = pneg %p416_p12  ;;  %s418_s10 = sshll.u32 %s480_s2, 4  ;;  %s419_s10 = int_to_ptr.vmem [resolvable:$false] %s418_s10 }
  0x1d   : > { %v227_v2 = vcombine.high %v225_v1, %v225_v1  ;;  %v230_v3 = vsel %vm229_vm0, %v225_v1, 0.0  ;;  %s420_s11 = scalar_lea.vmem %s419_s10, 256  ;;  %p421_p0 = scmp.lt.s32.totalorder %s583_s26, %s419_s10 }
  0x1e   : > { %p422_p1 = scmp.lt.s32.totalorder %s420_s11, %s414_s9 }
  0x1f   : > { %v231_v4 = vsel %vm229_vm0, %v227_v2, 0.0 }
  0x20   : > { %v232_v5 = vadd.f32 %v231_v4, %v230_v3  ;;  %p423_p2 = por %p422_p1, %p421_p0 }
  0x22   : > { %233 = vadd.xlane.f32.xlu0 %v232_v5  ;;  %p424_p3 = pnand %p423_p2, %p417_p13 }
  0xaf   : > { %v234_v8 = vpop.xlane.xlu0 %233 }
  0xb0   : > { %v235_v9 = vmul.f32 0.00390625, %v234_v8 }
  0xb2   : > { %v237_v10 = vmul.f32 %v236_v7, %v235_v9 }
  0xb4   : > { %v239_v11 = vsel %vm238_vm1, %v237_v10, 0.0 }
  0xb5   : > { %v240_v12 = vrot.slane %v239_v11, 4 }
  0xb7   : > { %v241_v13 = vadd.f32 %v240_v12, %v239_v11 }
  0xb9   : > { %v242_v15 = vrot.slane %v241_v13, 2 }
  0xbb   : > { %v243_v16 = vadd.f32 %v242_v15, %v241_v13 }
  0xbd   : > { %v244_v18 = vrot.slane %v243_v16, 1 }
  0xbf   : > { %v245_v20 = vadd.f32 %v244_v18, %v243_v16 }
  0xc1   : > { %v247_v22 = vadd.f32 %v246_v19, %v245_v20 }
  0xc3   : > { %v248_v23 = vmax.f32 %v247_v22, 0.0 }
  0xc5   : > { %v253_v25 = vrot.slane %v248_v23, %v252_v21 }
  0xc7   : > { %v254_v27 = vmul.f32 %v253_v25, %v249_v24 }
  0xc9   : > { %v257_v28 = vadd.f32 %v256_v26, %v254_v27 }
  0xcb   : > { %v359_v29 = vmul.f32 -1.442695, %v257_v28 }
  0xcd   : > { %410 = vpow2.f32 %v359_v29 }
  0xd7   : > { %v411_v30 = vpop.eup %410 }
  0xd8   : > { %v261_v31 = vadd.f32 1.0, %v411_v30 }
  0xda   : > { %412 = vrcp.f32 %v261_v31 }
  0xe4   : > { %v413_v32 = vpop.eup %412 }
  0xe5   : > { %266 = vperm.xlu0 %408, %v413_v32  }
 0x164   : > { %v267_v37 = vpop.permute.xlu0 %266 }
 0x165   : > { %v274_v38 = vrot.slane %v267_v37, %v273_v36 }
 0x167   : > { %v276_v39 = vmul.f32 %v274_v38, %v225_v1 }
 0x169   : > { %277 = vst [vmem:[%s219_s24] sm:$0xff] %v276_v39 }
 0x16a   : > { %427 = shalt.err (!%p424_p3)
}
 0x16b   : > { %s428_s12 = scalar_lea.hbm %s581_s7, 128  ;;  %s432_s15 = scalar_lea.hbm %s628_s5, 256 }
 0x16c   : > { %p429_p4 = scmp.ne.s32.totalorder %s581_s7, %s428_s12  ;;  %p433_p9 = scmp.lt.u32.totalorder %s581_s7, %s628_s5 }
 0x16d   : > { %p434_p10 = scmp.lt.u32.totalorder %s432_s15, %s428_s12  ;;  %p436_p12 = scmp.lt.u32.totalorder %s428_s12, %s581_s7 }
 0x16e   : > { %p430_p7 = pnand %p429_p4, %p552_p5 }
 0x16f   : > { %p435_p11 = por %p434_p10, %p433_p9 }
 0x170   : > { %p431_p8 = pneg %p430_p7 }
 0x171   : > { %p437_p13 = por %p436_p12, %p435_p11 }
 0x173   : > { %p438_p0 = pnand %p437_p13, %p431_p8 }
 0x175   : > { %441 = shalt.err (!%p438_p0)
}
 0x176   : > { %367 = dma.vmem_to_hbm [thread:$0]  (%p552_p5), %s583_s26, 128, %s581_s7, %s279_s8  }
 0x177 PF: > { %p373_p1 = scmp.ge.s32.totalorder %s476_s23, 2  ;;  %s305_s18 = sand.u32 1, %s464_s20  }
 0x178   : > { %s306_s19 = scalar_lea.sflag [#allocation4], %s305_s18 }
 0x179   : > { %p370_p2 = pnand %p373_p1, %p556_p6 }
 0x17b   : > { %459 = dma.done.wait (!%p370_p2), %s306_s19, 128  }
 0x17c   : > { %461 = vsyncadd (!%p370_p2), %s306_s19, 4294967168  ;;  %p17_p3 = scmp.ge.s32.totalorder %s539_s25, 4   ;;  %s631_s20 = smov %s468_s21 }
 0x17d   : > { %s632_s21 = smov %s472_s22  ;;  %s633_s22 = smov %s550_s28 }
 0x17e   : > { %s634_s23 = smov %s539_s25  ;;  %19 = sbr.rel (!%p17_p3) target bundleno = 6 (0x6), region = 75 }
 0x185   :  { %311 = vsyncpa [#allocation4], 1 }
 0x186   :  { %313 = vsyncpa [#allocation4 + $0x1], 1 }

</bundles_post_ra>
